<compile_context>
chip_gen: v5e
topology: v5e:2x2
jax: 0.10.0
libtpu: 0.0.40
codegen_flags: <defaults>
</compile_context>

<pallas_src>
import jax
import jax.numpy as jnp
import numpy as np
from jax.experimental import pallas as pl
from jax.experimental.pallas import tpu as pltpu

K = 5          # conv kernel size
PAD = 2        # 'same' padding for k=5, stride=1  (2*PAD == K-1: pad bands isolate sequences)
POOL_K = 3     # MaxPool1d kernel
POOL_S = 2     # MaxPool1d stride
HIDDEN = 32    # conv1 out channels
_PREC = jax.lax.Precision.HIGHEST   # exact-f32 MXU passes (kernel and reference use the same)


def _rot_left(v, t, ltot):
    """Lane rotation: result[:, j] = v[:, (j + t) % ltot]."""
    t = t % ltot
    if t == 0:
        return v
    if ltot % 128 == 0:
        return pltpu.roll(v, ltot - t, axis=1)            # XLU lane rotate (fast path)
    # lane width not 128-aligned: rotate via two static lane slices + concat (always lowers)
    return jnp.concatenate([v[:, t:], v[:, :t]], axis=1)


def _make_kernel(BN, L, Cin, Ch, Cout, Lp):
    LT = BN * (L + 2 * PAD)                               # lanes per grid step

    def kernel(x_ref, w1_ref, b1_ref, w2_ref, b2_ref, mask_ref, sel_ref, out_ref, xpad_ref):
        # x_ref   : (BN, Cin, L)     input slab, PyTorch NCL layout
        # w1_ref  : (Ch, K*Cin)      conv1 weights, im2col layout (col index = t*Cin + c)
        # b1_ref  : (Ch, 1)
        # w2_ref  : (Cout, K*Ch)     conv2 weights, im2col layout
        # b2_ref  : (Cout, 1)
        # mask_ref: (1, LT)          1.0 on the centered valid band of each sequence, else 0.0
        # sel_ref : (LT, BN*Lp)      one-hot pool-column selector (stride-2 gather as a matmul)
        # out_ref : (BN, Cout, Lp)   pooled output, PyTorch NCL layout
        # xpad_ref: VMEM (Cin, LT)   batch-concatenated, zero-banded padded input

        # ---- land x in the zero-banded padded scratch (re-initialized every step) ----
        xpad_ref[...] = jnp.zeros((Cin, LT), jnp.float32)
        for n in range(BN):                               # static, small
            base = n * (L + 2 * PAD)
            xpad_ref[:, base + PAD:base + PAD + L] = x_ref[n]
        xp = xpad_ref[...]                                 # (Cin, LT)

        # ---- conv1: fused K-tap im2col matmul + bias + ReLU (lane-dense) ----
        xcol = jnp.concatenate([_rot_left(xp, t, LT) for t in range(K)], axis=0)    # (K*Cin, LT)
        h = jnp.dot(w1_ref[...], xcol, precision=_PREC,
                    preferred_element_type=jnp.float32)                              # (Ch, LT)
        h = jnp.maximum(h + b1_ref[...], 0.0)

        # ---- re-pad conv1 activations: shift right by PAD, zero the pad bands ----
        hpad = _rot_left(h, LT - PAD, LT) * mask_ref[...]                            # (Ch, LT)

        # ---- conv2: fused im2col matmul + bias ----
        hcol = jnp.concatenate([_rot_left(hpad, t, LT) for t in range(K)], axis=0)  # (K*Ch, LT)
        y = jnp.dot(w2_ref[...], hcol, precision=_PREC,
                    preferred_element_type=jnp.float32)                              # (Cout, LT)
        y = y + b2_ref[...]

        # ---- residual add (x sits PAD lanes to the right in xpad) + ReLU ----
        y = jnp.maximum(y + _rot_left(xp, PAD, LT), 0.0)

        # ---- MaxPool1d(kernel=3, stride=2): rolled maxima + stride-2 gather via one matmul ----
        m = jnp.maximum(jnp.maximum(y, _rot_left(y, 1, LT)), _rot_left(y, 2, LT))
        pooled = jnp.dot(m, sel_ref[...], precision=_PREC,
                         preferred_element_type=jnp.float32)                          # (Cout, BN*Lp)
        for n in range(BN):                                # static
            out_ref[n, :, :] = pooled[:, n * Lp:(n + 1) * Lp]

    return kernel


def _choose_bn(N, L):
    lane_per = L + 2 * PAD
    bn = max(1, -(-512 // lane_per))       # aim for >= ~512 lanes per grid step
    bn = min(bn, N, 64)                    # temporaries (hcol ~ 640*BN*(L+4) B) stay << 64 MiB VMEM
    if N >= 2:
        bn = min(bn, -(-N // 2))           # keep grid >= 2 (v7x has 2 TensorCores)
    return max(1, bn)


def residual_block(x_ncl, w1, b1, w2, b2):
    """x_ncl: (N, Cin, L) float32, PyTorch NCL layout. Returns (N, Cout, Lp) in NCL layout."""
    N, Cin, L = x_ncl.shape
    Ch = w1.shape[0]
    Cout = w2.shape[0]
    assert w1.shape == (Ch, Cin, K) and w2.shape == (Cout, Ch, K)
    assert Cin == Cout, "residual add requires in_channels == out_channels"
    Lp = (L - POOL_K) // POOL_S + 1

    BN = _choose_bn(N, L)
    Npad = -(-N // BN) * BN
    x_f32 = x_ncl.astype(jnp.float32)
    if Npad != N:                          # pad the batch remainder (sliced off at the end)
        x_f32 = jnp.concatenate(
            [x_f32, jnp.zeros((Npad - N, Cin, L), jnp.float32)], axis=0)
    LT = BN * (L + 2 * PAD)

    # im2col weight layout, channels-on-columns: w_mat[o, t*Cin + c] = w[o, c, t]
    w1_mat = jnp.transpose(w1, (0, 2, 1)).reshape(Ch, K * Cin).astype(jnp.float32)
    w2_mat = jnp.transpose(w2, (0, 2, 1)).reshape(Cout, K * Ch).astype(jnp.float32)
    b1_c = b1.reshape(Ch, 1).astype(jnp.float32)
    b2_c = b2.reshape(Cout, 1).astype(jnp.float32)

    # tiny per-step lane constants: valid-band mask + stride-2 pool column selector
    pos = np.arange(LT)
    r = pos % (L + 2 * PAD)
    mask_np = ((r >= PAD) & (r < PAD + L)).astype(np.float32).reshape(1, LT)
    sel_np = np.zeros((LT, BN * Lp), np.float32)
    for n in range(BN):
        for p in range(Lp):
            sel_np[n * (L + 2 * PAD) + POOL_S * p, n * Lp + p] = 1.0
    mask = jnp.asarray(mask_np)
    sel = jnp.asarray(sel_np)

    steps = Npad // BN
    flops = steps * 2 * LT * (Ch * K * Cin + Cout * K * Ch + Cout * BN * Lp)
    bytes_accessed = 4 * (Npad * Cin * L + Npad * Cout * Lp
                          + steps * (Ch * K * Cin + Ch + Cout * K * Ch + Cout
                                     + LT + LT * BN * Lp))
    # rough per-step VMEM footprint (double-buffered blocks + matmul temporaries), f32
    est_vmem = 4 * (2 * BN * Cin * L + 2 * BN * Cout * Lp
                    + (Cin + K * Cin + 2 * Ch + K * Ch + 4 * Cout) * LT
                    + LT * BN * Lp + Ch * K * Cin + Cout * K * Ch)
    vmem_limit = int(min(48 * 2**20, max(16 * 2**20, 6 * est_vmem)))   # v7x-safe ceiling

    out = pl.pallas_call(
        _make_kernel(BN, L, Cin, Ch, Cout, Lp),
        out_shape=jax.ShapeDtypeStruct((Npad, Cout, Lp), jnp.float32),
        grid=(steps,),
        in_specs=[
            pl.BlockSpec((BN, Cin, L), lambda b: (b, 0, 0)),
            pl.BlockSpec((Ch, K * Cin), lambda b: (0, 0)),
            pl.BlockSpec((Ch, 1), lambda b: (0, 0)),
            pl.BlockSpec((Cout, K * Ch), lambda b: (0, 0)),
            pl.BlockSpec((Cout, 1), lambda b: (0, 0)),
            pl.BlockSpec((1, LT), lambda b: (0, 0)),
            pl.BlockSpec((LT, BN * Lp), lambda b: (0, 0)),
        ],
        out_specs=pl.BlockSpec((BN, Cout, Lp), lambda b: (b, 0, 0)),
        scratch_shapes=[pltpu.VMEM((Cin, LT), jnp.float32)],
        compiler_params=pltpu.CompilerParams(
            dimension_semantics=("parallel",),
            vmem_limit_bytes=vmem_limit),
        cost_estimate=pl.CostEstimate(flops=flops, transcendentals=0,
                                      bytes_accessed=bytes_accessed),
    )(x_f32, w1_mat, b1_c, w2_mat, b2_c, mask, sel)
    return out[:N]                                        # drop batch padding (if any)


def reference(x_ncl, w1, b1, w2, b2):
    """Pure-JAX reference matching the PyTorch forward (NCL layout)."""
    dn1 = jax.lax.conv_dimension_numbers(x_ncl.shape, w1.shape, ("NCH", "OIH", "NCH"))
    h = jax.lax.conv_general_dilated(x_ncl, w1, (1,), [(PAD, PAD)],
                                     dimension_numbers=dn1,
                                     precision=_PREC) + b1[None, :, None]
    h = jnp.maximum(h, 0.0)
    dn2 = jax.lax.conv_dimension_numbers(h.shape, w2.shape, ("NCH", "OIH", "NCH"))
    y = jax.lax.conv_general_dilated(h, w2, (1,), [(PAD, PAD)],
                                     dimension_numbers=dn2,
                                     precision=_PREC) + b2[None, :, None]
    y = jnp.maximum(y + x_ncl, 0.0)
    return jax.lax.reduce_window(y, -jnp.inf, jax.lax.max,
                                 (1, 1, POOL_K), (1, 1, POOL_S), "VALID")


if __name__ == "__main__":
    N, C, L = 2, 4, 16       # in_channels == out_channels == 4 (required by the residual add)

    key = jax.random.PRNGKey(0)
    k_x, k_w1, k_b1, k_w2, k_b2 = jax.random.split(key, 5)

    x = jax.random.normal(k_x, (N, C, L), dtype=jnp.float32)
    # PyTorch conv weight layout: (out_ch, in_ch, K)
    w1 = 0.1 * jax.random.normal(k_w1, (HIDDEN, C, K), dtype=jnp.float32)
    b1 = 0.1 * jax.random.normal(k_b1, (HIDDEN,), dtype=jnp.float32)
    w2 = 0.1 * jax.random.normal(k_w2, (C, HIDDEN, K), dtype=jnp.float32)
    b2 = 0.1 * jax.random.normal(k_b2, (C,), dtype=jnp.float32)

    out = residual_block(x, w1, b1, w2, b2)
    out = jax.block_until_ready(out)

    ref = jax.block_until_ready(reference(x, w1, b1, w2, b2))
    Lp = (L - POOL_K) // POOL_S + 1
    assert out.shape == ref.shape == (N, C, Lp), out.shape
    assert jnp.allclose(out, ref, atol=1e-3, rtol=1e-3), float(jnp.max(jnp.abs(out - ref)))

    print("KERNEL_OK")
</pallas_src>

<mosaic_0001>
module attributes {stable_mosaic.version = 11 : i64} {
  func.func @kernel(%arg0: i32, %arg1: memref<1x4x16xf32, #tpu.memory_space<vmem>>, %arg2: memref<32x20xf32, #tpu.memory_space<vmem>>, %arg3: memref<32x1xf32, #tpu.memory_space<vmem>>, %arg4: memref<4x160xf32, #tpu.memory_space<vmem>>, %arg5: memref<4x1xf32, #tpu.memory_space<vmem>>, %arg6: memref<1x20xf32, #tpu.memory_space<vmem>>, %arg7: memref<20x7xf32, #tpu.memory_space<vmem>>, %arg8: memref<1x4x7xf32, #tpu.memory_space<vmem>>, %arg9: memref<4x20xf32, #tpu.memory_space<vmem>>) attributes {dimension_semantics = [#tpu.dimension_semantics<parallel>], iteration_bounds = array<i64: 2>, scalar_prefetch = 0 : i64, scratch_operands = 1 : i64, tpu.core_type = #tpu.core_type<tc>, window_params = [{transform_indices = @transform_0, window_bounds = array<i64: 1, 4, 16>}, {pipeline_mode = #tpu.pipeline_mode<synchronous>, transform_indices = @transform_1, window_bounds = array<i64: 32, 20>}, {pipeline_mode = #tpu.pipeline_mode<synchronous>, transform_indices = @transform_2, window_bounds = array<i64: 32, 1>}, {pipeline_mode = #tpu.pipeline_mode<synchronous>, transform_indices = @transform_3, window_bounds = array<i64: 4, 160>}, {pipeline_mode = #tpu.pipeline_mode<synchronous>, transform_indices = @transform_4, window_bounds = array<i64: 4, 1>}, {pipeline_mode = #tpu.pipeline_mode<synchronous>, transform_indices = @transform_5, window_bounds = array<i64: 1, 20>}, {pipeline_mode = #tpu.pipeline_mode<synchronous>, transform_indices = @transform_6, window_bounds = array<i64: 20, 7>}, {transform_indices = @transform_7, window_bounds = array<i64: 1, 4, 7>}]} {
    %cst = arith.constant 0.000000e+00 : f32
    %0 = vector.broadcast %cst : f32 to vector<4x20xf32>
    %c0 = arith.constant 0 : index
    %c0_0 = arith.constant 0 : index
    %1 = vector.load %arg9[%c0, %c0_0] : memref<4x20xf32, #tpu.memory_space<vmem>>, vector<4x20xf32>
    tpu.vector_store %arg9[%c0, %c0_0], %0 {strides = array<i32>} : memref<4x20xf32, #tpu.memory_space<vmem>>, vector<4x20xf32>,
    %c0_1 = arith.constant 0 : index
    %c0_2 = arith.constant 0 : index
    %c0_3 = arith.constant 0 : index
    %2 = vector.load %arg1[%c0_1, %c0_2, %c0_3] : memref<1x4x16xf32, #tpu.memory_space<vmem>>, vector<1x4x16xf32>
    %3 = vector.shape_cast %2 : vector<1x4x16xf32> to vector<4x16xf32>
    %c0_4 = arith.constant 0 : index
    %c2 = arith.constant 2 : index
    %4 = vector.load %arg9[%c0_4, %c2] : memref<4x20xf32, #tpu.memory_space<vmem>>, vector<4x16xf32>
    tpu.vector_store %arg9[%c0_4, %c2], %3 {strides = array<i32>} : memref<4x20xf32, #tpu.memory_space<vmem>>, vector<4x16xf32>,
    %c0_5 = arith.constant 0 : index
    %c0_6 = arith.constant 0 : index
    %5 = vector.load %arg9[%c0_5, %c0_6] : memref<4x20xf32, #tpu.memory_space<vmem>>, vector<4x20xf32>
    %6 = vector.extract_strided_slice %5 {offsets = [0, 1], sizes = [4, 19], strides = [1, 1]} : vector<4x20xf32> to vector<4x19xf32>
    %7 = vector.extract_strided_slice %5 {offsets = [0, 0], sizes = [4, 1], strides = [1, 1]} : vector<4x20xf32> to vector<4x1xf32>
    %8 = tpu.concatenate %6, %7 in 1 : vector<4x19xf32>, vector<4x1xf32> -> vector<4x20xf32>
    %9 = vector.extract_strided_slice %5 {offsets = [0, 2], sizes = [4, 18], strides = [1, 1]} : vector<4x20xf32> to vector<4x18xf32>
    %10 = vector.extract_strided_slice %5 {offsets = [0, 0], sizes = [4, 2], strides = [1, 1]} : vector<4x20xf32> to vector<4x2xf32>
    %11 = tpu.concatenate %9, %10 in 1 : vector<4x18xf32>, vector<4x2xf32> -> vector<4x20xf32>
    %12 = vector.extract_strided_slice %5 {offsets = [0, 3], sizes = [4, 17], strides = [1, 1]} : vector<4x20xf32> to vector<4x17xf32>
    %13 = vector.extract_strided_slice %5 {offsets = [0, 0], sizes = [4, 3], strides = [1, 1]} : vector<4x20xf32> to vector<4x3xf32>
    %14 = tpu.concatenate %12, %13 in 1 : vector<4x17xf32>, vector<4x3xf32> -> vector<4x20xf32>
    %15 = vector.extract_strided_slice %5 {offsets = [0, 4], sizes = [4, 16], strides = [1, 1]} : vector<4x20xf32> to vector<4x16xf32>
    %16 = vector.extract_strided_slice %5 {offsets = [0, 0], sizes = [4, 4], strides = [1, 1]} : vector<4x20xf32> to vector<4x4xf32>
    %17 = tpu.concatenate %15, %16 in 1 : vector<4x16xf32>, vector<4x4xf32> -> vector<4x20xf32>
    %18 = tpu.concatenate %5, %8, %11, %14, %17 in 0 : vector<4x20xf32>, vector<4x20xf32>, vector<4x20xf32>, vector<4x20xf32>, vector<4x20xf32> -> vector<20x20xf32>
    %c0_7 = arith.constant 0 : index
    %c0_8 = arith.constant 0 : index
    %19 = vector.load %arg2[%c0_7, %c0_8] : memref<32x20xf32, #tpu.memory_space<vmem>>, vector<32x20xf32>
    %cst_9 = arith.constant dense<0.000000e+00> : vector<32x20xf32>
    %20 = tpu.matmul %19, %18, %cst_9 {dimension_numbers = #tpu.dot_dimension_numbers<[1], [0], [0], [1], [0, 0, 1, 1], [], []>, precision = #tpu.contract_precision<fp32>} : vector<32x20xf32>, vector<20x20xf32>, vector<32x20xf32> -> vector<32x20xf32>
    %c0_10 = arith.constant 0 : index
    %c0_11 = arith.constant 0 : index
    %21 = vector.load %arg3[%c0_10, %c0_11] : memref<32x1xf32, #tpu.memory_space<vmem>>, vector<32x1xf32>
    %22 = vector.broadcast %21 : vector<32x1xf32> to vector<32x20xf32>
    %23 = arith.addf %20, %22 : vector<32x20xf32>
    %cst_12 = arith.constant 0.000000e+00 : f32
    %24 = vector.broadcast %cst_12 : f32 to vector<32x20xf32>
    %25 = arith.maximumf %23, %24 : vector<32x20xf32>
    %26 = vector.extract_strided_slice %25 {offsets = [0, 18], sizes = [32, 2], strides = [1, 1]} : vector<32x20xf32> to vector<32x2xf32>
    %27 = vector.extract_strided_slice %25 {offsets = [0, 0], sizes = [32, 18], strides = [1, 1]} : vector<32x20xf32> to vector<32x18xf32>
    %28 = tpu.concatenate %26, %27 in 1 : vector<32x2xf32>, vector<32x18xf32> -> vector<32x20xf32>
    %c0_13 = arith.constant 0 : index
    %c0_14 = arith.constant 0 : index
    %29 = vector.load %arg6[%c0_13, %c0_14] : memref<1x20xf32, #tpu.memory_space<vmem>>, vector<1x20xf32>
    %30 = vector.broadcast %29 : vector<1x20xf32> to vector<32x20xf32>
    %31 = arith.mulf %28, %30 : vector<32x20xf32>
    %32 = vector.extract_strided_slice %31 {offsets = [0, 1], sizes = [32, 19], strides = [1, 1]} : vector<32x20xf32> to vector<32x19xf32>
    %33 = vector.extract_strided_slice %31 {offsets = [0, 0], sizes = [32, 1], strides = [1, 1]} : vector<32x20xf32> to vector<32x1xf32>
    %34 = tpu.concatenate %32, %33 in 1 : vector<32x19xf32>, vector<32x1xf32> -> vector<32x20xf32>
    %35 = vector.extract_strided_slice %31 {offsets = [0, 2], sizes = [32, 18], strides = [1, 1]} : vector<32x20xf32> to vector<32x18xf32>
    %36 = vector.extract_strided_slice %31 {offsets = [0, 0], sizes = [32, 2], strides = [1, 1]} : vector<32x20xf32> to vector<32x2xf32>
    %37 = tpu.concatenate %35, %36 in 1 : vector<32x18xf32>, vector<32x2xf32> -> vector<32x20xf32>
    %38 = vector.extract_strided_slice %31 {offsets = [0, 3], sizes = [32, 17], strides = [1, 1]} : vector<32x20xf32> to vector<32x17xf32>
    %39 = vector.extract_strided_slice %31 {offsets = [0, 0], sizes = [32, 3], strides = [1, 1]} : vector<32x20xf32> to vector<32x3xf32>
    %40 = tpu.concatenate %38, %39 in 1 : vector<32x17xf32>, vector<32x3xf32> -> vector<32x20xf32>
    %41 = vector.extract_strided_slice %31 {offsets = [0, 4], sizes = [32, 16], strides = [1, 1]} : vector<32x20xf32> to vector<32x16xf32>
    %42 = vector.extract_strided_slice %31 {offsets = [0, 0], sizes = [32, 4], strides = [1, 1]} : vector<32x20xf32> to vector<32x4xf32>
    %43 = tpu.concatenate %41, %42 in 1 : vector<32x16xf32>, vector<32x4xf32> -> vector<32x20xf32>
    %44 = tpu.concatenate %31, %34, %37, %40, %43 in 0 : vector<32x20xf32>, vector<32x20xf32>, vector<32x20xf32>, vector<32x20xf32>, vector<32x20xf32> -> vector<160x20xf32>
    %c0_15 = arith.constant 0 : index
    %c0_16 = arith.constant 0 : index
    %45 = vector.load %arg4[%c0_15, %c0_16] : memref<4x160xf32, #tpu.memory_space<vmem>>, vector<4x160xf32>
    %cst_17 = arith.constant dense<0.000000e+00> : vector<4x20xf32>
    %46 = tpu.matmul %45, %44, %cst_17 {dimension_numbers = #tpu.dot_dimension_numbers<[1], [0], [0], [1], [0, 0, 1, 1], [], []>, precision = #tpu.contract_precision<fp32>} : vector<4x160xf32>, vector<160x20xf32>, vector<4x20xf32> -> vector<4x20xf32>
    %c0_18 = arith.constant 0 : index
    %c0_19 = arith.constant 0 : index
    %47 = vector.load %arg5[%c0_18, %c0_19] : memref<4x1xf32, #tpu.memory_space<vmem>>, vector<4x1xf32>
    %48 = vector.broadcast %47 : vector<4x1xf32> to vector<4x20xf32>
    %49 = arith.addf %46, %48 : vector<4x20xf32>
    %50 = vector.extract_strided_slice %5 {offsets = [0, 2], sizes = [4, 18], strides = [1, 1]} : vector<4x20xf32> to vector<4x18xf32>
    %51 = vector.extract_strided_slice %5 {offsets = [0, 0], sizes = [4, 2], strides = [1, 1]} : vector<4x20xf32> to vector<4x2xf32>
    %52 = tpu.concatenate %50, %51 in 1 : vector<4x18xf32>, vector<4x2xf32> -> vector<4x20xf32>
    %53 = arith.addf %49, %52 : vector<4x20xf32>
    %cst_20 = arith.constant 0.000000e+00 : f32
    %54 = vector.broadcast %cst_20 : f32 to vector<4x20xf32>
    %55 = arith.maximumf %53, %54 : vector<4x20xf32>
    %56 = vector.extract_strided_slice %55 {offsets = [0, 1], sizes = [4, 19], strides = [1, 1]} : vector<4x20xf32> to vector<4x19xf32>
    %57 = vector.extract_strided_slice %55 {offsets = [0, 0], sizes = [4, 1], strides = [1, 1]} : vector<4x20xf32> to vector<4x1xf32>
    %58 = tpu.concatenate %56, %57 in 1 : vector<4x19xf32>, vector<4x1xf32> -> vector<4x20xf32>
    %59 = arith.maximumf %55, %58 : vector<4x20xf32>
    %60 = vector.extract_strided_slice %55 {offsets = [0, 2], sizes = [4, 18], strides = [1, 1]} : vector<4x20xf32> to vector<4x18xf32>
    %61 = vector.extract_strided_slice %55 {offsets = [0, 0], sizes = [4, 2], strides = [1, 1]} : vector<4x20xf32> to vector<4x2xf32>
    %62 = tpu.concatenate %60, %61 in 1 : vector<4x18xf32>, vector<4x2xf32> -> vector<4x20xf32>
    %63 = arith.maximumf %59, %62 : vector<4x20xf32>
    %c0_21 = arith.constant 0 : index
    %c0_22 = arith.constant 0 : index
    %64 = vector.load %arg7[%c0_21, %c0_22] : memref<20x7xf32, #tpu.memory_space<vmem>>, vector<20x7xf32>
    %cst_23 = arith.constant dense<0.000000e+00> : vector<4x7xf32>
    %65 = tpu.matmul %63, %64, %cst_23 {dimension_numbers = #tpu.dot_dimension_numbers<[1], [0], [0], [1], [0, 0, 1, 1], [], []>, precision = #tpu.contract_precision<fp32>} : vector<4x20xf32>, vector<20x7xf32>, vector<4x7xf32> -> vector<4x7xf32>
    %c0_24 = arith.constant 0 : index
    %c0_25 = arith.constant 0 : index
    %c0_26 = arith.constant 0 : index
    %66 = vector.load %arg8[%c0_24, %c0_25, %c0_26] : memref<1x4x7xf32, #tpu.memory_space<vmem>>, vector<1x4x7xf32>
    %67 = vector.shape_cast %66 : vector<1x4x7xf32> to vector<4x7xf32>
    %68 = vector.shape_cast %65 : vector<4x7xf32> to vector<1x4x7xf32>
    tpu.vector_store %arg8[%c0_24, %c0_25, %c0_26], %68 {strides = array<i32>} : memref<1x4x7xf32, #tpu.memory_space<vmem>>, vector<1x4x7xf32>,
    return
  }
  func.func @transform_0(%arg0: i32) -> (i32, i32, i32) {
    %c0_i32 = arith.constant 0 : i32
    %c0_i32_0 = arith.constant 0 : i32
    %c0_i32_1 = arith.constant 0 : i32
    return %arg0, %c0_i32, %c0_i32_0 : i32, i32, i32
  }
  func.func @transform_1(%arg0: i32) -> (i32, i32) {
    %c0_i32 = arith.constant 0 : i32
    %c0_i32_0 = arith.constant 0 : i32
    %c0_i32_1 = arith.constant 0 : i32
    return %c0_i32, %c0_i32_0 : i32, i32
  }
  func.func @transform_2(%arg0: i32) -> (i32, i32) {
    %c0_i32 = arith.constant 0 : i32
    %c0_i32_0 = arith.constant 0 : i32
    %c0_i32_1 = arith.constant 0 : i32
    return %c0_i32, %c0_i32_0 : i32, i32
  }
  func.func @transform_3(%arg0: i32) -> (i32, i32) {
    %c0_i32 = arith.constant 0 : i32
    %c0_i32_0 = arith.constant 0 : i32
    %c0_i32_1 = arith.constant 0 : i32
    return %c0_i32, %c0_i32_0 : i32, i32
  }
  func.func @transform_4(%arg0: i32) -> (i32, i32) {
    %c0_i32 = arith.constant 0 : i32
    %c0_i32_0 = arith.constant 0 : i32
    %c0_i32_1 = arith.constant 0 : i32
    return %c0_i32, %c0_i32_0 : i32, i32
  }
  func.func @transform_5(%arg0: i32) -> (i32, i32) {
    %c0_i32 = arith.constant 0 : i32
    %c0_i32_0 = arith.constant 0 : i32
    %c0_i32_1 = arith.constant 0 : i32
    return %c0_i32, %c0_i32_0 : i32, i32
  }
  func.func @transform_6(%arg0: i32) -> (i32, i32) {
    %c0_i32 = arith.constant 0 : i32
    %c0_i32_0 = arith.constant 0 : i32
    %c0_i32_1 = arith.constant 0 : i32
    return %c0_i32, %c0_i32_0 : i32, i32
  }
  func.func @transform_7(%arg0: i32) -> (i32, i32, i32) {
    %c0_i32 = arith.constant 0 : i32
    %c0_i32_0 = arith.constant 0 : i32
    %c0_i32_1 = arith.constant 0 : i32
    return %arg0, %c0_i32, %c0_i32_0 : i32, i32, i32
  }
}

</mosaic_0001>

<bundles_post_ra>
// kernel: tpu_custom_call.1
= control target key start
LH: loop header
LB: loop body
LE: loop exit
PB: predicated region body
PF: predicated region fallthrough
CT: control target
= control target key end

     0   :  { %12 = vsyncpa [#allocation4], 0  ;;  %s2396_s0 = inlined_call_operand.vmem [shape: f32[2,4,16], index: 0, kind: input, shape index: {}]   ;;  %s2397_s1 = inlined_call_operand.vmem [shape: f32[32,20], index: 1, kind: input, shape index: {}]   ;;  %s2398_s2 = inlined_call_operand.vmem [shape: f32[32,1], index: 2, kind: input, shape index: {}]   ;;  %s2399_s3 = inlined_call_operand.vmem [shape: f32[4,160], index: 3, kind: input, shape index: {}]   ;;  %s2400_s4 = inlined_call_operand.vmem [shape: f32[4,1], index: 4, kind: input, shape index: {}]   ;;  %s2401_s5 = inlined_call_operand.vmem [shape: f32[1,20], index: 5, kind: input, shape index: {}]   ;;  %s2402_s6 = inlined_call_operand.vmem [shape: f32[20,7], index: 6, kind: input, shape index: {}]   ;;  %s2403_s7 = inlined_call_operand.hbm [shape: f32[2,4,7], index: 7, kind: output, shape index: {}]  }
   0x1   :  { %14 = vsyncpa [#allocation4 + $0x1], 0  ;;  %s1795_s24 = smov 0   ;;  %s1797_s25 = smov 0  }
   0x2   :  { %s1799_s26 = smov 0   ;;  %s1801_s27 = smov 0  }
   0x3 LB: > { %s1816_s28 = sadd.s32 4294967295, %s1741_s27   ;;  %s1614_s29 = sadd.s32 4294967294, %s1741_s27   ;;  %s1741_s27 = sphi %s1801_s27, %s2418_s27   ;;  %s1737_s26 = sphi %s1799_s26, %s2417_s26   ;;  %s1733_s25 = sphi %s1797_s25, %s2416_s25   ;;  %s1729_s24 = sphi %s1795_s24, %s2415_s24  }
   0x4   : > { %s1820_s30 = sadd.s32 1, %s1741_s27   ;;  %s179_s8 = sadd.s32 1, %s1737_s26 }
   0x5   : > { %s176_s9 = ssub.s32 %s1741_s27, %s1820_s30  ;;  %p189_p0 = scmp.ne.s32.totalorder %s1737_s26, %s1733_s25 }
   0x6   : > { %p177_p1 = scmp.eq.s32.totalorder %s176_s9, 0  ;;  %p190_p2 = scmp.eq.s32.totalorder %s1816_s28, 1 }
   0x7   : > { %p195_p3 = scmp.ne.s32.totalorder %s1733_s25, %s1729_s24  ;;  %p196_p4 = scmp.eq.s32.totalorder %s1614_s29, 1 }
   0x8   : > { %s1831_s10 = scalar_select %p177_p1, %s1737_s26, %s179_s8  }
   0x9   : > { %p1833_p5 = por %p190_p2, %p189_p0  ;;  %p1837_p6 = por %p196_p4, %p195_p3 }
   0xa   : > { %p1617_p7 = scmp.ge.s32.totalorder %s1741_s27, 1  ;;  %p239_p8 = scmp.lt.s32.totalorder %s1741_s27, 3 }
   0xc   : > { %p240_p9 = pnand %p1617_p7, %p239_p8 }
   0xd   : > { %p270_p10 = scmp.lt.s32.totalorder (!%p240_p9), %s1816_s28, 1  ;;  %s1744_s18 = smov (!%p240_p9), 2  }
   0xe   : > { %243 = sbr.rel (%p240_p9) target bundleno = 1234 (0x4d2), region = 48  ;;  %s2404_s19 = smov (!%p240_p9), 16  }
   0xf   : > { %s1746_s20 = smov (!%p240_p9), 17   ;;  %s1747_s21 = smov (!%p240_p9), 125  }
  0x10   : > { %s1748_s22 = smov (!%p240_p9), 127   ;;  %s1749_s23 = smov (!%p240_p9), 124  }
  0x11   : > { %s1750_s29 = smov (!%p240_p9), 19   ;;  %s1751_s8 = smov (!%p240_p9), 18  }
  0x12   : > { %s1752_s9 = smov (!%p240_p9), 126   ;;  %s1754_s16 = smov (!%p240_p9), 110  }
  0x13   : > { %vm274_vm0 = vcmask 158720   ;;  %v1743_v0 = vmov 0.0   ;;  %s271_s13 = scalar_select %p270_p10, %s1816_s28, 1  ;;  %vm281_vm1 = vcmask 142352   ;;  %v326_v5 = vld [vmem:[%s2397_s1] sm:$0xff]  ;;  %vm354_vm2 = vcmask 162816  }
  0x14   : > { %275 = vst.msk [vmem:[#allocation2] sm:$0xf] %vm274_vm0, %v1743_v0  ;;  %v1753_v7 = vmov 0   ;;  %v356_v9 = vsel %vm354_vm2, %v326_v5, 0  ;;  %v332_v10 = vld [vmem:[%s2398_s2 + $0x10] sm:$0xff]  ;;  %vm315_vm3 = vcmask 130048  }
  0x15   : > { %s1619_s14 = sshll.u32 %s271_s13, 2  ;;  %1676 = vset.pattern.permute.xlu1 %v1753_v7  ;;  %1675 = vset.pattern.permute.xlu0 %v1753_v7  ;;  %v1864_v11 = vand.u32 4294901760, %v356_v9  ;;  %v327_v13 = vld [vmem:[%s2397_s1 + $0x8] sm:$0xff]  ;;  %vm323_vm4 = vcmask 1043456   ;;  %vm291_vm5 = vcmask 154624   ;;  %v330_v16 = vld [vmem:[%s2398_s2] sm:$0xff] }
  0x16   : > { %s273_s17 = scalar_lea.vmem %s2396_s0, %s1619_s14  ;;  %1677 = vset.pattern.permute.xlu2 %v1753_v7  ;;  %v359_v19 = vsel %vm354_vm2, %v327_v13, 0  ;;  %vm307_vm6 = vcmask 138240   ;;  %vm299_vm7 = vcmask 146432   ;;  %v328_v30 = vld [vmem:[%s2397_s1 + $0x10] sm:$0xff]  ;;  %v329_v49 = vld [vmem:[%s2397_s1 + $0x18] sm:$0xff]  ;;  %vm667_vm8 = vcmask 15360  }
  0x17   : > { %v276_v1 = vld [vmem:[%s273_s17] sm:$0xf]  ;;  %v390_v15 = vsub.f32 %v356_v9, %v1864_v11  ;;  %v1877_v25 = vand.u32 4294901760, %v359_v19  ;;  %v362_v40 = vsel %vm354_vm2, %v328_v30, 0  ;;  %v365_v55 = vsel %vm354_vm2, %v329_v49, 0  ;;  %v333_v63 = vld [vmem:[%s2398_s2 + $0x18] sm:$0xff] }
  0x18   : > { %278 = vrot.lane.b32.xlu0 %v276_v1, %s1744_s18  ;;  %v405_v46 = vand.u32 4294901760, %v362_v40  ;;  %v413_v59 = vand.u32 4294901760, %v365_v55  ;;  %vm808_vm9 = vcmask 261120   ;;  %vm1537_vm10 = vcmask 52224  }
  0x19   : > { %v391_v24 = vand.u32 4294901760, %v390_v15  ;;  %v398_v36 = vsub.f32 %v359_v19, %v1877_v25 }
  0x1a   : > { %v406_v52 = vsub.f32 %v362_v40, %v405_v46  ;;  %v414_v62 = vsub.f32 %v365_v55, %v413_v59 }
  0x1b   : > { %v392_v35 = vsub.f32 %v390_v15, %v391_v24  ;;  %v399_v45 = vand.u32 4294901760, %v398_v36 }
  0x1c   : > { %v407_v58 = vand.u32 4294901760, %v406_v52  ;;  %v415_v1 = vand.u32 4294901760, %v414_v62 }
  0x1d   : > { %v393_v44 = vand.u32 4294901760, %v392_v35  ;;  %v400_v51 = vsub.f32 %v398_v36, %v399_v45 }
  0x1e   : > { %v408_v61 = vsub.f32 %v406_v52, %v407_v58 }
  0x1f   : > { %v401_v57 = vand.u32 4294901760, %v400_v51 }
  0x20   : > { %v409_v0 = vand.u32 4294901760, %v408_v61 }
  0x8a   : > { %v279_v2 = vpop.permute.xlu0 %278 }
  0x8b   : > { %282 = vst.msk [vmem:[#allocation2] sm:$0xf] %vm281_vm1, %v279_v2  ;;  %v416_v2 = vsub.f32 %v414_v62, %v415_v1 }
  0x92   : > { %v283_v3 = vld [vmem:[#allocation2] sm:$0xf] }
  0x93   : > { %312 = vrot.lane.b32.xlu2 %v283_v3, %s2404_s19  ;;  %304 = vrot.lane.b32.xlu1 %v283_v3, %s1746_s20 }
  0x94   : > { %301 = vrot.lane.b32.xlu0 %v283_v3, %s1747_s21 }
  0x9b   : > { %285 = vrot.lane.b32.xlu2 %v283_v3, %s1748_s22  ;;  %309 = vrot.lane.b32.xlu1 %v283_v3, %s1749_s23 }
  0x9c   : > { %288 = vrot.lane.b32.xlu0 %v283_v3, %s1750_s29 }
  0xa3   : > { %296 = vrot.lane.b32.xlu2 %v283_v3, %s1751_s8  ;;  %293 = vrot.lane.b32.xlu1 %v283_v3, %s1752_s9 }
  0xa4   : > { %351 = vperm.xlu0 %1675, %v333_v63  }
  0xab   : > { %346 = vperm.xlu1 %1676, %v332_v10  }
  0xb3   : > { %336 = vperm.xlu1 %1676, %v330_v16  }
  0xed   : > { %v313_v4 = vpop.permute.xlu2 %312 }
  0xf5   : > { %v286_v12 = vpop.permute.xlu2 %285 }
  0xfd   : > { %v297_v32 = vpop.permute.xlu2 %296 }
 0x105   : > { %v305_v6 = vpop.permute.xlu1 %304 }
 0x106   : > { %v302_v8 = vpop.permute.xlu0 %301 }
 0x107   : > { %v308_v26 = vsel %vm307_vm6, %v302_v8, %v305_v6 }
 0x108   : > { %v321_v33 = vrot.slane %v308_v26, 4 }
 0x10d   : > { %v310_v14 = vpop.permute.xlu1 %309 }
 0x10e   : > { %v316_v17 = vsel %vm315_vm3, %v310_v14, %v313_v4  ;;  %v289_v18 = vpop.permute.xlu0 %288  ;;  %v417_v4 = vand.u32 4294901760, %v416_v2 }
 0x10f   : > { %v368_v20 = vsel %vm323_vm4, %v316_v17, 0  ;;  %v292_v21 = vsel %vm291_vm5, %v286_v12, %v289_v18 }
 0x110   : > { %v383_v22 = vand.u32 4294901760, %v368_v20  ;;  %v318_v23 = vrot.slane %v292_v21, 4 }
 0x112   : > { %v436_v27 = vsub.f32 %v368_v20, %v383_v22  ;;  %v324_v28 = vsel %vm323_vm4, %v283_v3, %v318_v23  ;;  %384 = vmatpush.msra.mxu0 %v383_v22  ;;  %527 = vmatpush.msra.mxu3 %v383_v22  ;;  %v331_v3 = vld [vmem:[%s2398_s2 + $0x8] sm:$0xff] }
 0x113   : > { %v387_v29 = vand.u32 4294901760, %v324_v28  ;;  %341 = vperm.xlu2 %1677, %v331_v3  }
 0x114   : > { %485 = vmatpush.msra.mxu2 %v436_v27  ;;  %v437_v31 = vand.u32 4294901760, %v436_v27 }
 0x115   : > { %v294_v34 = vpop.permute.xlu1 %293  ;;  %v448_v39 = vsub.f32 %v324_v28, %v387_v29 }
 0x116   : > { %v1886_v37 = vsel %vm299_vm7, %v294_v34, %v297_v32  ;;  %v438_v38 = vsub.f32 %v436_v27, %v437_v31 }
 0x117   : > { %v325_v41 = vsel %vm323_vm4, %v1886_v37, %v321_v33  ;;  %v449_v48 = vand.u32 4294901760, %v448_v39 }
 0x118   : > { %v385_v42 = vand.u32 4294901760, %v325_v41  ;;  %v439_v43 = vand.u32 4294901760, %v438_v38  ;;  %v352_v38 = vpop.permute.xlu0 %351 }
 0x119   : > { %v450_v54 = vsub.f32 %v448_v39, %v449_v48 }
 0x11a   : > { %386 = vmatpush.msra.mxu0 %v385_v42  ;;  %440 = vmatpush.msra.mxu1 %v439_v43  ;;  %v442_v47 = vsub.f32 %v325_v41, %v385_v42 }
 0x11b   : > { %529 = vmatpush.msra.mxu3 %v385_v42  ;;  %v451_v60 = vand.u32 4294901760, %v450_v54 }
 0x11c   : > { %388 = vmatpush.msra.mxu0 %v387_v29  ;;  %488 = vmatpush.msra.mxu2 %v442_v47  ;;  %v443_v50 = vand.u32 4294901760, %v442_v47 }
 0x11d   : > { %531 = vmatpush.msra.mxu3 %v387_v29  ;;  %394 = vmatmul.f32.vlgmr.msra.gmra.mxu0 %v393_v44  ;;  %v347_v8 = vpop.permute.xlu1 %346 }
 0x11e   : > { %573 = vmatpush.msrb.mxu0 %v437_v31  ;;  %491 = vmatpush.msra.mxu2 %v448_v39  ;;  %v444_v53 = vsub.f32 %v442_v47, %v443_v50 }
 0x11f   : > { %494 = vmatmul.f32.vlgmr.msra.gmra.mxu2 %v390_v15  ;;  %535 = vmatmul.f32.vlgmr.msra.gmra.mxu3 %v391_v24 }
 0x120   : > { %577 = vmatpush.msrb.mxu0 %v443_v50  ;;  %v445_v56 = vand.u32 4294901760, %v444_v53 }
 0x122   : > { %581 = vmatpush.msrb.mxu0 %v449_v48  ;;  %446 = vmatpush.msra.mxu1 %v445_v56 }
 0x124   : > { %452 = vmatpush.msra.mxu1 %v451_v60 }
 0x125   : > { %402 = vmatmul.f32.gmra.mxu0 %v401_v57  ;;  %454 = vmatmul.f32.vlgmr.msra.gmra.mxu1 %v1864_v11  ;;  %v337_v12 = vpop.permute.xlu1 %336 }
 0x126   : > { %613 = vmatpush.msrb.mxu1 %v383_v22 }
 0x127   : > { %499 = vmatmul.f32.gmra.mxu2 %v398_v36  ;;  %541 = vmatmul.f32.gmra.mxu3 %v399_v45 }
 0x128   : > { %615 = vmatpush.msrb.mxu1 %v385_v42 }
 0x12a   : > { %617 = vmatpush.msrb.mxu1 %v387_v29 }
 0x12d   : > { %410 = vmatmul.f32.gmra.mxu0 %v409_v0  ;;  %458 = vmatmul.f32.gmra.mxu1 %v1877_v25 }
 0x12f   : > { %504 = vmatmul.f32.gmra.mxu2 %v406_v52  ;;  %547 = vmatmul.f32.gmra.mxu3 %v407_v58 }
 0x135   : > { %418 = vmatmul.f32.gmra.mxu0 %v417_v4  ;;  %462 = vmatmul.f32.gmra.mxu1 %v405_v46 }
 0x137   : > { %509 = vmatmul.f32.gmra.mxu2 %v414_v62  ;;  %553 = vmatmul.f32.gmra.mxu3 %v415_v1  ;;  %v1678_v62 = vld [vmem:[%s2401_s5] ss:$0 sm:$0xff] }
 0x13d   : > { %466 = vmatmul.f32.gmra.mxu1 %v413_v59  ;;  %583 = vmatmul.f32.vlgmr.msrb.gmra.mxu0 %v1864_v11 }
 0x145   : > { %587 = vmatmul.f32.gmra.mxu0 %v1877_v25  ;;  %619 = vmatmul.f32.vlgmr.msrb.gmra.mxu1 %v1864_v11 }
 0x14d   : > { %591 = vmatmul.f32.gmra.mxu0 %v405_v46  ;;  %623 = vmatmul.f32.gmra.mxu1 %v1877_v25 }
 0x155   : > { %595 = vmatmul.f32.gmra.mxu0 %v413_v59  ;;  %627 = vmatmul.f32.gmra.mxu1 %v405_v46 }
 0x15d   : > { %631 = vmatmul.f32.gmra.mxu1 %v413_v59 }
 0x16d   : > { %v342_v11 = vpop.permute.xlu2 %341 }
 0x19a   : > { %v395_v5 = vpop.f32.mrf.mxu0 }
 0x19b   : > { %v396_v16 = vadd.f32 %v395_v5, %v337_v12 }
 0x1a2   : > { %v403_v6 = vpop.f32.mrf.mxu0  ;;  %v455_v7 = vpop.f32.mrf.mxu1 }
 0x1a3   : > { %v495_v13 = vpop.f32.mrf.mxu2  ;;  %v536_v17 = vpop.f32.mrf.mxu3  ;;  %v456_v18 = vadd.f32 %v455_v7, %v396_v16  ;;  %v404_v22 = vadd.f32 %v403_v6, %v342_v11  ;;  %v797_v16 = vld [vmem:[%s2400_s4] sm:$0xf] }
 0x1a5   : > { %v496_v21 = vadd.f32 %v495_v13, %v456_v18 }
 0x1a7   : > { %v537_v24 = vadd.f32 %v536_v17, %v496_v21 }
 0x1aa   : > { %v411_v9 = vpop.f32.mrf.mxu0  ;;  %v459_v10 = vpop.f32.mrf.mxu1 }
 0x1ab   : > { %v500_v23 = vpop.f32.mrf.mxu2  ;;  %v460_v25 = vadd.f32 %v459_v10, %v404_v22  ;;  %v542_v26 = vpop.f32.mrf.mxu3  ;;  %v412_v30 = vadd.f32 %v411_v9, %v347_v8 }
 0x1ad   : > { %v501_v31 = vadd.f32 %v500_v23, %v460_v25 }
 0x1af   : > { %v543_v35 = vadd.f32 %v542_v26, %v501_v31 }
 0x1b2   : > { %v419_v14 = vpop.f32.mrf.mxu0  ;;  %v463_v15 = vpop.f32.mrf.mxu1 }
 0x1b3   : > { %v505_v34 = vpop.f32.mrf.mxu2  ;;  %v464_v36 = vadd.f32 %v463_v15, %v412_v30  ;;  %v548_v40 = vpop.f32.mrf.mxu3  ;;  %v420_v43 = vadd.f32 %v419_v14, %v352_v38 }
 0x1b5   : > { %v506_v42 = vadd.f32 %v505_v34, %v464_v36 }
 0x1b7   : > { %v549_v47 = vadd.f32 %v548_v40, %v506_v42 }
 0x1ba   : > { %v467_v19 = vpop.f32.mrf.mxu1  ;;  %v584_v20 = vpop.f32.mrf.mxu0 }
 0x1bb   : > { %v585_v27 = vadd.f32 %v584_v20, %v537_v24  ;;  %v468_v48 = vadd.f32 %v467_v19, %v420_v43  ;;  %v510_v49 = vpop.f32.mrf.mxu2  ;;  %v554_v54 = vpop.f32.mrf.mxu3 }
 0x1bd   : > { %v511_v52 = vadd.f32 %v510_v49, %v468_v48 }
 0x1bf   : > { %v555_v57 = vadd.f32 %v554_v54, %v511_v52 }
 0x1c2   : > { %v588_v28 = vpop.f32.mrf.mxu0  ;;  %v620_v29 = vpop.f32.mrf.mxu1 }
 0x1c3   : > { %v621_v32 = vadd.f32 %v620_v29, %v585_v27  ;;  %v589_v39 = vadd.f32 %v588_v28, %v543_v35  ;;  %v796_v27 = vld [vmem:[%s2399_s3] sm:$0xff] }
 0x1c4   : > { %804 = vst [vmem:[#allocation1] ss:$2 sm:$0xff] %v796_v27 }
 0x1c5   : > { %v635_v33 = vmax.f32 %v621_v32, 0.0 }
 0x1c7   : > { %655 = vrot.lane.b32.xlu0 %v635_v33, %s1744_s18  ;;  %643 = vrot.lane.b32.xlu2 %v635_v33, %s1754_s16 }
 0x1ca   : > { %v624_v41 = vpop.f32.mrf.mxu1  ;;  %v592_v45 = vpop.f32.mrf.mxu0 }
 0x1cb   : > { %v625_v44 = vadd.f32 %v624_v41, %v589_v39  ;;  %v593_v50 = vadd.f32 %v592_v45, %v549_v47 }
 0x1cd   : > { %v636_v46 = vmax.f32 %v625_v44, 0.0 }
 0x1cf   : > { %657 = vrot.lane.b32.xlu1 %v636_v46, %s1744_s18  ;;  %645 = vrot.lane.b32.xlu0 %v636_v46, %s1754_s16 }
 0x1d2   : > { %v628_v51 = vpop.f32.mrf.mxu1  ;;  %v596_v56 = vpop.f32.mrf.mxu0 }
 0x1d3   : > { %v629_v53 = vadd.f32 %v628_v51, %v593_v50  ;;  %v597_v58 = vadd.f32 %v596_v56, %v555_v57 }
 0x1d5   : > { %v637_v55 = vmax.f32 %v629_v53, 0.0 }
 0x1d7   : > { %647 = vrot.lane.b32.xlu1 %v637_v55, %s1754_s16  ;;  %659 = vrot.lane.b32.xlu2 %v637_v55, %s1744_s18 }
 0x1da   : > { %v632_v59 = vpop.f32.mrf.mxu1 }
 0x1db   : > { %v633_v60 = vadd.f32 %v632_v59, %v597_v58 }
 0x1dd   : > { %v638_v61 = vmax.f32 %v633_v60, 0.0 }
 0x1df   : > { %661 = vrot.lane.b32.xlu0 %v638_v61, %s1744_s18  ;;  %649 = vrot.lane.b32.xlu2 %v638_v61, %s1754_s16  ;;  %s2411_s18 = smov 16  }
 0x221   : > { %v644_v63 = vpop.permute.xlu2 %643 }
 0x231   : > { %v660_v7 = vpop.permute.xlu2 %659 }
 0x239   : > { %v656_v0 = vpop.permute.xlu0 %655  ;;  %v650_v13 = vpop.permute.xlu2 %649 }
 0x23a   : > { %v668_v1 = vsel %vm667_vm8, %v644_v63, %v656_v0 }
 0x23b   : > { %v1919_v2 = vmul.f32 %v1678_v62, %v668_v1 }
 0x23d   : > { %712 = vrot.lane.b32.xlu0 %v1919_v2, %s1752_s9  ;;  %752 = vrot.lane.b32.xlu2 %v1919_v2, %s1746_s20 }
 0x23e   : > { %740 = vrot.lane.b32.xlu1 %v1919_v2, %s1747_s21 }
 0x241   : > { %v658_v3 = vpop.permute.xlu1 %657  ;;  %v646_v4 = vpop.permute.xlu0 %645 }
 0x242   : > { %v669_v5 = vsel %vm667_vm8, %v646_v4, %v658_v3 }
 0x243   : > { %v1928_v6 = vmul.f32 %v1678_v62, %v669_v5 }
 0x245   : > { %754 = vrot.lane.b32.xlu0 %v1928_v6, %s1746_s20  ;;  %742 = vrot.lane.b32.xlu2 %v1928_v6, %s1747_s21 }
 0x246   : > { %724 = vrot.lane.b32.xlu1 %v1919_v2, %s1751_s8 }
 0x249   : > { %v648_v8 = vpop.permute.xlu1 %647 }
 0x24a   : > { %v670_v9 = vsel %vm667_vm8, %v648_v8, %v660_v7 }
 0x24b   : > { %v1937_v10 = vmul.f32 %v1678_v62, %v670_v9 }
 0x24d   : > { %744 = vrot.lane.b32.xlu0 %v1937_v10, %s1747_s21  ;;  %726 = vrot.lane.b32.xlu2 %v1928_v6, %s1751_s8 }
 0x24e   : > { %714 = vrot.lane.b32.xlu1 %v1928_v6, %s1752_s9 }
 0x251   : > { %v662_v12 = vpop.permute.xlu0 %661 }
 0x252   : > { %v671_v14 = vsel %vm667_vm8, %v650_v13, %v662_v12 }
 0x253   : > { %v1952_v15 = vmul.f32 %v1678_v62, %v671_v14 }
 0x255   : > { %728 = vrot.lane.b32.xlu0 %v1937_v10, %s1751_s8  ;;  %716 = vrot.lane.b32.xlu2 %v1937_v10, %s1752_s9 }
 0x256   : > { %756 = vrot.lane.b32.xlu1 %v1937_v10, %s1746_s20 }
 0x25d   : > { %718 = vrot.lane.b32.xlu0 %v1952_v15, %s1752_s9  ;;  %758 = vrot.lane.b32.xlu2 %v1952_v15, %s1746_s20 }
 0x25e   : > { %746 = vrot.lane.b32.xlu1 %v1952_v15, %s1747_s21 }
 0x265   : > { %686 = vrot.lane.b32.xlu0 %v1928_v6, %s1748_s22  ;;  %700 = vrot.lane.b32.xlu2 %v1937_v10, %s1750_s29 }
 0x266   : > { %730 = vrot.lane.b32.xlu1 %v1952_v15, %s1751_s8 }
 0x26d   : > { %702 = vrot.lane.b32.xlu0 %v1952_v15, %s1750_s29  ;;  %690 = vrot.lane.b32.xlu2 %v1952_v15, %s1748_s22 }
 0x26e   : > { %688 = vrot.lane.b32.xlu1 %v1937_v10, %s1748_s22 }
 0x275   : > { %696 = vrot.lane.b32.xlu0 %v1919_v2, %s1750_s29  ;;  %684 = vrot.lane.b32.xlu2 %v1919_v2, %s1748_s22 }
 0x276   : > { %698 = vrot.lane.b32.xlu1 %v1928_v6, %s1750_s29 }
 0x27d   : > { %772 = vrot.lane.b32.xlu0 %v1937_v10, %s1749_s23  ;;  %770 = vrot.lane.b32.xlu2 %v1928_v6, %s1749_s23 }
 0x27e   : > { %784 = vrot.lane.b32.xlu1 %v1937_v10, %s2411_s18 }
 0x285   : > { %782 = vrot.lane.b32.xlu0 %v1928_v6, %s2411_s18  ;;  %786 = vrot.lane.b32.xlu2 %v1952_v15, %s2411_s18 }
 0x286   : > { %774 = vrot.lane.b32.xlu1 %v1952_v15, %s1749_s23 }
 0x28d   : > { %800 = vperm.xlu0 %1675, %v797_v16   ;;  %780 = vrot.lane.b32.xlu2 %v1919_v2, %s2411_s18  ;;  %s1699_s18 = scalar_lea.hbm %s2403_s7, 8 }
 0x28e   : > { %768 = vrot.lane.b32.xlu1 %v1919_v2, %s1749_s23 }
 0x297   : > { %v753_v17 = vpop.permute.xlu2 %752 }
 0x29f   : > { %v743_v18 = vpop.permute.xlu2 %742 }
 0x2a7   : > { %v727_v19 = vpop.permute.xlu2 %726 }
 0x2af   : > { %v713_v11 = vpop.permute.xlu0 %712  ;;  %v717_v23 = vpop.permute.xlu2 %716 }
 0x2b0   : > { %v741_v20 = vpop.permute.xlu1 %740 }
 0x2b1   : > { %v764_v32 = vsel %vm307_vm6, %v741_v20, %v753_v17 }
 0x2b2   : > { %v2009_v36 = vand.u32 4294901760, %v764_v32 }
 0x2b4   : > { %v2022_v45 = vsub.f32 %v764_v32, %v2009_v36 }
 0x2b6   : > { %v872_v55 = vand.u32 4294901760, %v2022_v45 }
 0x2b7   : > { %v755_v21 = vpop.permute.xlu0 %754  ;;  %v759_v26 = vpop.permute.xlu2 %758 }
 0x2b8   : > { %v725_v22 = vpop.permute.xlu1 %724  ;;  %v765_v31 = vsel %vm307_vm6, %v743_v18, %v755_v21  ;;  %v873_v4 = vsub.f32 %v2022_v45, %v872_v55 }
 0x2b9   : > { %v2005_v34 = vand.u32 4294901760, %v765_v31  ;;  %v736_v50 = vsel %vm299_vm7, %v713_v11, %v725_v22 }
 0x2ba   : > { %v2044_v56 = vand.u32 4294901760, %v736_v50  ;;  %v874_v17 = vand.u32 4294901760, %v873_v4 }
 0x2bb   : > { %v2017_v43 = vsub.f32 %v765_v31, %v2005_v34 }
 0x2bc   : > { %v2074_v5 = vsub.f32 %v736_v50, %v2044_v56 }
 0x2bd   : > { %v866_v53 = vand.u32 4294901760, %v2017_v43 }
 0x2be   : > { %v896_v21 = vand.u32 4294901760, %v2074_v5 }
 0x2bf   : > { %v745_v24 = vpop.permute.xlu0 %744  ;;  %v2007_v35 = vpop.permute.xlu2 %700  ;;  %v867_v3 = vsub.f32 %v2017_v43, %v866_v53 }
 0x2c0   : > { %v715_v25 = vpop.permute.xlu1 %714  ;;  %v897_v32 = vsub.f32 %v2074_v5, %v896_v21 }
 0x2c1   : > { %v737_v46 = vsel %vm299_vm7, %v715_v25, %v727_v19  ;;  %v868_v12 = vand.u32 4294901760, %v867_v3 }
 0x2c2   : > { %v2034_v51 = vand.u32 4294901760, %v737_v46 }
 0x2c4   : > { %v2060_v63 = vsub.f32 %v737_v46, %v2034_v51 }
 0x2c6   : > { %v890_v14 = vand.u32 4294901760, %v2060_v63 }
 0x2c7   : > { %v729_v28 = vpop.permute.xlu0 %728  ;;  %v691_v57 = vpop.permute.xlu2 %690 }
 0x2c8   : > { %v757_v29 = vpop.permute.xlu1 %756  ;;  %v738_v41 = vsel %vm299_vm7, %v717_v23, %v729_v28  ;;  %v891_v28 = vsub.f32 %v2060_v63, %v890_v14 }
 0x2c9   : > { %v766_v30 = vsel %vm307_vm6, %v745_v24, %v757_v29  ;;  %v2025_v47 = vand.u32 4294901760, %v738_v41  ;;  %v805_v24 = vld.sshfl [vmem:[#allocation1] sm:$0xff pattern:$0x75316420] }
 0x2ca   : > { %v2003_v33 = vand.u32 4294901760, %v766_v30 }
 0x2cb   : > { %v2047_v58 = vsub.f32 %v738_v41, %v2025_v47 }
 0x2cc   : > { %v2012_v39 = vsub.f32 %v766_v30, %v2003_v33 }
 0x2cd   : > { %v884_v9 = vand.u32 4294901760, %v2047_v58 }
 0x2ce   : > { %v860_v49 = vand.u32 4294901760, %v2012_v39 }
 0x2cf   : > { %v719_v38 = vpop.permute.xlu0 %718  ;;  %v885_v20 = vsub.f32 %v2047_v58, %v884_v9  ;;  %v685_v25 = vpop.permute.xlu2 %684 }
 0x2d0   : > { %v747_v40 = vpop.permute.xlu1 %746  ;;  %v861_v61 = vsub.f32 %v2012_v39, %v860_v49 }
 0x2d1   : > { %v767_v42 = vsel %vm307_vm6, %v747_v40, %v759_v26  ;;  %v886_v31 = vand.u32 4294901760, %v885_v20  ;;  %v892_v40 = vand.u32 4294901760, %v891_v28 }
 0x2d2   : > { %v2019_v44 = vand.u32 4294901760, %v767_v42  ;;  %v862_v8 = vand.u32 4294901760, %v861_v61  ;;  %v898_v61 = vand.u32 4294901760, %v897_v32 }
 0x2d4   : > { %v2028_v48 = vsub.f32 %v767_v42, %v2019_v44  ;;  %812 = vmatpush.msrb.mxu2 %v2019_v44  ;;  %1008 = vmatpush.msra.mxu1 %v2019_v44  ;;  %v2129_v42 = vand.u32 4294901760, %v1952_v15 }
 0x2d6   : > { %814 = vmatpush.msrb.mxu2 %v2003_v33  ;;  %955 = vmatpush.msra.mxu0 %v2028_v48  ;;  %v854_v52 = vand.u32 4294901760, %v2028_v48 }
 0x2d7   : > { %1010 = vmatpush.msra.mxu1 %v2003_v33  ;;  %v2041_v54 = vpop.permute.xlu0 %686 }
 0x2d8   : > { %v731_v59 = vpop.permute.xlu1 %730  ;;  %816 = vmatpush.msrb.mxu2 %v2005_v34  ;;  %958 = vmatpush.msra.mxu0 %v2012_v39  ;;  %v855_v60 = vsub.f32 %v2028_v48, %v854_v52 }
 0x2d9   : > { %v739_v62 = vsel %vm299_vm7, %v719_v38, %v731_v59  ;;  %1012 = vmatpush.msra.mxu1 %v2005_v34 }
 0x2da   : > { %v2062_v0 = vand.u32 4294901760, %v739_v62  ;;  %818 = vmatpush.msrb.mxu2 %v2009_v36  ;;  %961 = vmatpush.msra.mxu0 %v2017_v43  ;;  %v856_v1 = vand.u32 4294901760, %v855_v60 }
 0x2db   : > { %1014 = vmatpush.msra.mxu1 %v2009_v36 }
 0x2dc   : > { %v2077_v7 = vsub.f32 %v739_v62, %v2062_v0  ;;  %820 = vmatpush.msrb.mxu2 %v2062_v0  ;;  %857 = vmatpush.msrb.mxu3 %v856_v1 }
 0x2dd   : > { %964 = vmatpush.msra.mxu0 %v2022_v45  ;;  %1016 = vmatpush.msra.mxu1 %v2062_v0 }
 0x2de   : > { %822 = vmatpush.msrb.mxu2 %v2025_v47  ;;  %863 = vmatpush.msrb.mxu3 %v862_v8  ;;  %v878_v13 = vand.u32 4294901760, %v2077_v7 }
 0x2df   : > { %967 = vmatpush.msra.mxu0 %v2077_v7  ;;  %1018 = vmatpush.msra.mxu1 %v2025_v47  ;;  %v703_v16 = vpop.permute.xlu0 %702 }
 0x2e0   : > { %v689_v18 = vpop.permute.xlu1 %688  ;;  %824 = vmatpush.msrb.mxu2 %v2034_v51  ;;  %869 = vmatpush.msrb.mxu3 %v868_v12  ;;  %v711_v11 = vsel %vm291_vm5, %v691_v57, %v703_v16  ;;  %v879_v19 = vsub.f32 %v2077_v7, %v878_v13  ;;  %v2137_v57 = vand.u32 4294901760, %v1937_v10  ;;  %v2155_v16 = vsub.f32 %v1952_v15, %v2129_v42 }
 0x2e1   : > { %v710_v22 = vsel %vm291_vm5, %v689_v18, %v2007_v35  ;;  %970 = vmatpush.msra.mxu0 %v2047_v58  ;;  %1020 = vmatpush.msra.mxu1 %v2034_v51  ;;  %v2101_v23 = vand.u32 4294901760, %v711_v11  ;;  %v2121_v35 = vand.u32 4294901760, %v805_v24 }
 0x2e2   : > { %v2103_v26 = vand.u32 4294901760, %v710_v22  ;;  %826 = vmatpush.msrb.mxu2 %v2044_v56  ;;  %875 = vmatpush.msrb.mxu3 %v874_v17  ;;  %v880_v27 = vand.u32 4294901760, %v879_v19  ;;  %v2158_v17 = vand.u32 4294901760, %v1928_v6  ;;  %v2172_v15 = vsub.f32 %v1937_v10, %v2137_v57 }
 0x2e3   : > { %v2110_v29 = vsub.f32 %v711_v11, %v2101_v23  ;;  %973 = vmatpush.msra.mxu0 %v2060_v63  ;;  %1022 = vmatpush.msra.mxu1 %v2044_v56  ;;  %v2144_v1 = vsub.f32 %v805_v24, %v2121_v35  ;;  %v771_v11 = vpop.permute.xlu2 %770  ;;  %v2407_v28 = vand.u32 4294901760, %v2155_v16 }
 0x2e4   : > { %v2115_v30 = vsub.f32 %v710_v22, %v2103_v26  ;;  %828 = vmatpush.msrb.mxu2 %v2101_v23  ;;  %881 = vmatpush.msrb.mxu3 %v880_v27  ;;  %v2181_v27 = vsub.f32 %v1928_v6, %v2158_v17 }
 0x2e5   : > { %976 = vmatpush.msra.mxu0 %v2074_v5  ;;  %1024 = vmatpush.msra.mxu1 %v2101_v23  ;;  %v902_v38 = vand.u32 4294901760, %v2110_v29  ;;  %v845_v22 = vand.u32 4294901760, %v2144_v1 }
 0x2e6   : > { %830 = vmatpush.msrb.mxu2 %v2103_v26  ;;  %887 = vmatpush.msrb.mxu3 %v886_v31  ;;  %v908_v41 = vand.u32 4294901760, %v2115_v30 }
 0x2e7   : > { %979 = vmatpush.msra.mxu0 %v2110_v29  ;;  %1026 = vmatpush.msra.mxu1 %v2103_v26  ;;  %v697_v46 = vpop.permute.xlu0 %696  ;;  %v903_v50 = vsub.f32 %v2110_v29, %v902_v38 }
 0x2e8   : > { %v699_v59 = vpop.permute.xlu1 %698  ;;  %893 = vmatpush.msrb.mxu3 %v892_v40  ;;  %v708_v60 = vsel %vm291_vm5, %v685_v25, %v697_v46  ;;  %v909_v62 = vsub.f32 %v2115_v30, %v908_v41  ;;  %v846_v46 = vsub.f32 %v2144_v1, %v845_v22 }
 0x2e9   : > { %v709_v3 = vsel %vm291_vm5, %v2041_v54, %v699_v59  ;;  %982 = vmatpush.msra.mxu0 %v2115_v30  ;;  %v2149_v4 = vand.u32 4294901760, %v708_v60  ;;  %v904_v8 = vand.u32 4294901760, %v903_v50  ;;  %v2164_v54 = vand.u32 4294901760, %v1919_v2 }
 0x2ea   : > { %v2151_v12 = vand.u32 4294901760, %v709_v3  ;;  %899 = vmatpush.msrb.mxu3 %v898_v61  ;;  %v910_v20 = vand.u32 4294901760, %v909_v62  ;;  %v2406_v50 = vand.u32 4294901760, %v2172_v15  ;;  %v2408_v61 = vand.u32 4294901760, %v2181_v27 }
 0x2eb   : > { %v2161_v18 = vsub.f32 %v708_v60, %v2149_v4  ;;  %v2188_v31 = vsub.f32 %v1919_v2, %v2164_v54  ;;  %v927_v60 = vsub.f32 %v2155_v16, %v2407_v28 }
 0x2ec   : > { %v2167_v19 = vsub.f32 %v709_v3, %v2151_v12  ;;  %832 = vmatpush.msrb.mxu2 %v2151_v12  ;;  %905 = vmatpush.msrb.mxu3 %v904_v8  ;;  %v847_v3 = vand.u32 4294901760, %v846_v46  ;;  %v933_v8 = vsub.f32 %v2172_v15, %v2406_v50 }
 0x2ed   : > { %1028 = vmatpush.msra.mxu1 %v2151_v12  ;;  %v920_v24 = vand.u32 4294901760, %v2161_v18 }
 0x2ee   : > { %834 = vmatpush.msrb.mxu2 %v2149_v4  ;;  %911 = vmatpush.msrb.mxu3 %v910_v20  ;;  %v914_v25 = vand.u32 4294901760, %v2167_v19  ;;  %v944_v20 = vand.u32 4294901760, %v2188_v31  ;;  %v934_v28 = vand.u32 4294901760, %v933_v8 }
 0x2ef   : > { %985 = vmatpush.msra.mxu0 %v2167_v19  ;;  %1030 = vmatpush.msra.mxu1 %v2149_v4  ;;  %v773_v10 = vpop.permute.xlu0 %772  ;;  %v921_v6 = vsub.f32 %v2161_v18, %v920_v24 }
 0x2f0   : > { %v785_v32 = vpop.permute.xlu1 %784  ;;  %836 = vmatpush.msrb.mxu2 %v2129_v42  ;;  %v915_v40 = vsub.f32 %v2167_v19, %v914_v25 }
 0x2f1   : > { %988 = vmatpush.msra.mxu0 %v2161_v18  ;;  %1032 = vmatpush.msra.mxu1 %v2129_v42  ;;  %v794_v2 = vsel %vm315_vm3, %v773_v10, %v785_v32  ;;  %v922_v62 = vand.u32 4294901760, %v921_v6  ;;  %v787_v32 = vpop.permute.xlu2 %786  ;;  %v939_v6 = vsub.f32 %v2181_v27, %v2408_v61 }
 0x2f2   : > { %838 = vmatpush.msrb.mxu2 %v2137_v57  ;;  %v916_v59 = vand.u32 4294901760, %v915_v40  ;;  %v2214_v10 = vand.u32 4294901760, %v794_v2  ;;  %v928_v40 = vand.u32 4294901760, %v927_v60 }
 0x2f3   : > { %991 = vmatpush.msra.mxu0 %v2155_v16  ;;  %1034 = vmatpush.msra.mxu1 %v2137_v57 }
 0x2f4   : > { %840 = vmatpush.msrb.mxu2 %v2158_v17  ;;  %917 = vmatpush.msrb.mxu3 %v916_v59  ;;  %v2229_v60 = vsub.f32 %v794_v2, %v2214_v10 }
 0x2f5   : > { %994 = vmatpush.msra.mxu0 %v2172_v15  ;;  %1036 = vmatpush.msra.mxu1 %v2158_v17 }
 0x2f6   : > { %842 = vmatpush.msrb.mxu2 %v2164_v54  ;;  %923 = vmatpush.msrb.mxu3 %v922_v62  ;;  %v945_v62 = vsub.f32 %v2188_v31, %v944_v20 }
 0x2f7   : > { %997 = vmatpush.msra.mxu0 %v2181_v27  ;;  %1038 = vmatpush.msra.mxu1 %v2164_v54  ;;  %v783_v46 = vpop.permute.xlu0 %782 }
 0x2f8   : > { %848 = vmatmul.f32.vlgmr.msrb.gmra.mxu2 %v847_v3  ;;  %v775_v59 = vpop.permute.xlu1 %774  ;;  %929 = vmatpush.msrb.mxu3 %v928_v40  ;;  %v793_v50 = vsel %vm315_vm3, %v771_v11, %v783_v46  ;;  %v940_v11 = vand.u32 4294901760, %v939_v6  ;;  %v1358_v46 = vld [vmem:[%s2402_s6 + $0x10] sm:$0xf] }
 0x2f9   : > { %1049 = vmatpush.msra.mxu2 %v854_v52  ;;  %v795_v61 = vsel %vm315_vm3, %v775_v59, %v787_v32  ;;  %1000 = vmatpush.msra.mxu0 %v2188_v31  ;;  %v2235_v3 = vand.u32 4294901760, %v793_v50  ;;  %v946_v52 = vand.u32 4294901760, %v945_v62  ;;  %v781_v43 = vpop.permute.xlu2 %780  ;;  %v1363_v62 = vsel %vm323_vm4, %v1358_v46, 0 }
 0x2fa   : > { %v2237_v40 = vand.u32 4294901760, %v795_v61  ;;  %935 = vmatpush.msrb.mxu3 %v934_v28  ;;  %1003 = vmatmul.f32.vlgmr.msra.gmra.mxu0 %v2144_v1  ;;  %v1201_v28 = vand.u32 4294901760, %v2229_v60  ;;  %v806_v1 = vld.sshfl [vmem:[#allocation1 + $0x8] sm:$0xff pattern:$0x75316420] }
 0x2fb   : > { %v2241_v8 = vsub.f32 %v793_v50, %v2235_v3  ;;  %1053 = vmatpush.msra.mxu2 %v860_v49  ;;  %1042 = vmatmul.f32.vlgmr.msra.gmra.mxu1 %v845_v22  ;;  %v809_v39 = vsel %vm808_vm9, %v806_v1, 0 }
 0x2fc   : > { %v2246_v48 = vsub.f32 %v795_v61, %v2237_v40  ;;  %941 = vmatpush.msrb.mxu3 %v940_v11  ;;  %1165 = vmatpush.msrb.mxu0 %v2237_v40  ;;  %v2258_v22 = vand.u32 4294901760, %v809_v39 }
 0x2fd   : > { %1057 = vmatpush.msra.mxu2 %v866_v53  ;;  %v1207_v49 = vand.u32 4294901760, %v2241_v8 }
 0x2fe   : > { %v1195_v50 = vand.u32 4294901760, %v2246_v48  ;;  %947 = vmatpush.msrb.mxu3 %v946_v52  ;;  %1167 = vmatpush.msrb.mxu0 %v2214_v10  ;;  %v2268_v61 = vsub.f32 %v809_v39, %v2258_v22 }
 0x2ff   : > { %1061 = vmatpush.msra.mxu2 %v872_v55  ;;  %949 = vmatmul.f32.vlgmr.msrb.gmra.mxu3 %v2121_v35  ;;  %v1202_v55 = vsub.f32 %v2229_v60, %v1201_v28 }
 0x300   : > { %v1196_v53 = vsub.f32 %v2246_v48, %v1195_v50  ;;  %1116 = vmatpush.msra.mxu3 %v2019_v44  ;;  %v769_v2 = vpop.permute.xlu1 %768  ;;  %1169 = vmatpush.msrb.mxu0 %v2235_v3  ;;  %v1208_v44 = vsub.f32 %v2241_v8, %v1207_v49  ;;  %v1174_v7 = vand.u32 4294901760, %v2268_v61 }
 0x301   : > { %1065 = vmatpush.msra.mxu2 %v878_v13  ;;  %v792_v45 = vsel %vm315_vm3, %v769_v2, %v781_v43 }
 0x302   : > { %v2270_v32 = vand.u32 4294901760, %v792_v45  ;;  %1118 = vmatpush.msra.mxu3 %v2003_v33  ;;  %v1197_v6 = vand.u32 4294901760, %v1196_v53  ;;  %v1203_v33 = vand.u32 4294901760, %v1202_v55  ;;  %v1175_v58 = vsub.f32 %v2268_v61, %v1174_v7 }
 0x303   : > { %1069 = vmatpush.msra.mxu2 %v884_v9 }
 0x304   : > { %v1212_v13 = vsub.f32 %v792_v45, %v2270_v32  ;;  %1120 = vmatpush.msra.mxu3 %v2005_v34  ;;  %1171 = vmatpush.msrb.mxu0 %v2270_v32  ;;  %v1209_v34 = vand.u32 4294901760, %v1208_v44  ;;  %v1176_v59 = vand.u32 4294901760, %v1175_v58 }
 0x305   : > { %1073 = vmatpush.msra.mxu2 %v890_v14  ;;  %1198 = vmatpush.msrb.mxu1 %v1197_v6  ;;  %v2296_v14 = vand.u32 4294901760, %v1363_v62 }
 0x306   : > { %1122 = vmatpush.msra.mxu3 %v2009_v36  ;;  %1294 = vmatpush.msra.mxu0 %v1195_v50  ;;  %v1213_v9 = vand.u32 4294901760, %v1212_v13 }
 0x307   : > { %1077 = vmatpush.msra.mxu2 %v896_v21  ;;  %1204 = vmatpush.msrb.mxu1 %v1203_v33  ;;  %v801_v21 = vpop.permute.xlu0 %800 }
 0x308   : > { %1124 = vmatpush.msra.mxu3 %v2062_v0  ;;  %1298 = vmatpush.msra.mxu0 %v1201_v28  ;;  %v1214_v63 = vsub.f32 %v1212_v13, %v1213_v9  ;;  %v2414_v0 = vand.u32 4294901760, %v2181_v27 }
 0x309   : > { %1081 = vmatpush.msra.mxu2 %v902_v38  ;;  %1210 = vmatpush.msrb.mxu1 %v1209_v34 }
 0x30a   : > { %1126 = vmatpush.msra.mxu3 %v2025_v47  ;;  %1302 = vmatpush.msra.mxu0 %v1207_v49  ;;  %v1215_v36 = vand.u32 4294901760, %v1214_v63  ;;  %v2306_v47 = vsub.f32 %v1363_v62, %v2296_v14 }
 0x30b   : > { %1085 = vmatpush.msra.mxu2 %v908_v41  ;;  %1177 = vmatmul.f32.vlgmr.msrb.gmra.mxu0 %v1176_v59 }
 0x30c   : > { %1128 = vmatpush.msra.mxu3 %v2034_v51  ;;  %1306 = vmatpush.msra.mxu0 %v1213_v9  ;;  %v2412_v51 = vand.u32 4294901760, %v2155_v16 }
 0x30d   : > { %1089 = vmatpush.msra.mxu2 %v914_v25  ;;  %1216 = vmatpush.msrb.mxu1 %v1215_v36 }
 0x30e   : > { %1130 = vmatpush.msra.mxu3 %v2044_v56  ;;  %1218 = vmatmul.f32.vlgmr.msrb.gmra.mxu1 %v2258_v22  ;;  %v2413_v56 = vand.u32 4294901760, %v2172_v15 }
 0x30f   : > { %1325 = vmatpush.msra.mxu1 %v2237_v40  ;;  %1093 = vmatpush.msra.mxu2 %v920_v24 }
 0x310   : > { %1132 = vmatpush.msra.mxu3 %v2101_v23  ;;  %1444 = vmatpush.msrb.mxu0 %v2306_v47 }
 0x311   : > { %1327 = vmatpush.msra.mxu1 %v2214_v10  ;;  %1097 = vmatpush.msra.mxu2 %v2412_v51 }
 0x312   : > { %1134 = vmatpush.msra.mxu3 %v2103_v26 }
 0x313   : > { %1329 = vmatpush.msra.mxu1 %v2235_v3  ;;  %1101 = vmatpush.msra.mxu2 %v2413_v56 }
 0x314   : > { %1308 = vmatmul.f32.vlgmr.msra.gmra.mxu0 %v2258_v22  ;;  %1136 = vmatpush.msra.mxu3 %v2151_v12 }
 0x315   : > { %1331 = vmatpush.msra.mxu1 %v2270_v32  ;;  %1105 = vmatpush.msra.mxu2 %v2414_v0 }
 0x316   : > { %1138 = vmatpush.msra.mxu3 %v2149_v4  ;;  %1333 = vmatmul.f32.vlgmr.msra.gmra.mxu1 %v2258_v22 }
 0x317   : > { %1471 = vmatpush.msrb.mxu1 %v2296_v14  ;;  %1109 = vmatpush.msra.mxu2 %v944_v20 }
 0x318   : > { %1111 = vmatmul.f32.vlgmr.msra.gmra.mxu2 %v2121_v35  ;;  %1140 = vmatpush.msra.mxu3 %v2129_v42 }
 0x319   : > { %1236 = vmatpush.msrb.mxu2 %v2246_v48 }
 0x31a   : > { %1142 = vmatpush.msra.mxu3 %v2137_v57 }
 0x31b   : > { %1239 = vmatpush.msrb.mxu2 %v2229_v60 }
 0x31c   : > { %1144 = vmatpush.msra.mxu3 %v2158_v17 }
 0x31d   : > { %1242 = vmatpush.msrb.mxu2 %v2241_v8  ;;  %v1356_v8 = vld [vmem:[%s2402_s6] sm:$0xff] }
 0x31e   : > { %1146 = vmatpush.msra.mxu3 %v2164_v54  ;;  %v1382_v52 = vand.u32 4294901760, %v1356_v8 }
 0x31f   : > { %1245 = vmatpush.msrb.mxu2 %v1212_v13  ;;  %1148 = vmatmul.f32.vlgmr.msra.gmra.mxu3 %v2121_v35 }
 0x320   : > { %1265 = vmatpush.msrb.mxu3 %v2237_v40  ;;  %1248 = vmatmul.f32.vlgmr.msrb.gmra.mxu2 %v2268_v61  ;;  %v1357_v40 = vld [vmem:[%s2402_s6 + $0x8] sm:$0xff]  ;;  %v1419_v50 = vsub.f32 %v1356_v8, %v1382_v52 }
 0x321   : > { %1379 = vmatpush.msra.mxu2 %v2296_v14  ;;  %v1380_v11 = vand.u32 4294901760, %v1357_v40 }
 0x322   : > { %1267 = vmatpush.msrb.mxu3 %v2214_v10  ;;  %v1420_v22 = vand.u32 4294901760, %v1419_v50 }
 0x323   : > { %v1413_v48 = vsub.f32 %v1357_v40, %v1380_v11  ;;  %1473 = vmatpush.msrb.mxu1 %v1380_v11  ;;  %1381 = vmatpush.msra.mxu2 %v1380_v11 }
 0x324   : > { %1269 = vmatpush.msrb.mxu3 %v2235_v3  ;;  %v1421_v53 = vsub.f32 %v1419_v50, %v1420_v22 }
 0x325   : > { %v1414_v1 = vand.u32 4294901760, %v1413_v48  ;;  %1447 = vmatpush.msrb.mxu0 %v1413_v48  ;;  %1475 = vmatpush.msrb.mxu1 %v1382_v52 }
 0x326   : > { %1271 = vmatpush.msrb.mxu3 %v2270_v32  ;;  %1383 = vmatpush.msra.mxu2 %v1382_v52  ;;  %v1422_v2 = vand.u32 4294901760, %v1421_v53 }
 0x327   : > { %1275 = vmatmul.f32.vlgmr.msrb.gmra.mxu3 %v1174_v7  ;;  %v1415_v49 = vsub.f32 %v1413_v48, %v1414_v1  ;;  %1450 = vmatpush.msrb.mxu0 %v1419_v50 }
 0x329   : > { %v1416_v43 = vand.u32 4294901760, %v1415_v49 }
 0x377   : > { %v1004_v30 = vpop.f32.mrf.mxu0 }
 0x378   : > { %v1043_v35 = vpop.f32.mrf.mxu1 }
 0x37b   : > { %v849_v5 = vpop.f32.mrf.mxu2 }
 0x37c   : > { %v850_v26 = vadd.f32 %v849_v5, %v801_v21 }
 0x382   : > { %v950_v23 = vpop.f32.mrf.mxu3 }
 0x383   : > { %v951_v29 = vadd.f32 %v950_v23, %v850_v26 }
 0x385   : > { %v1005_v38 = vadd.f32 %v1004_v30, %v951_v29 }
 0x387   : > { %v1044_v42 = vadd.f32 %v1043_v35, %v1005_v38 }
 0x388   : > { %v1178_v57 = vpop.f32.mrf.mxu0 }
 0x38b   : > { %v1219_v16 = vpop.f32.mrf.mxu1 }
 0x391   : > { %v1309_v25 = vpop.f32.mrf.mxu0 }
 0x393   : > { %v1334_v31 = vpop.f32.mrf.mxu1 }
 0x39b   : > { %v1112_v41 = vpop.f32.mrf.mxu2 }
 0x39c   : > { %v1113_v4 = vadd.f32 %v1112_v41, %v1044_v42 }
 0x3a2   : > { %v1149_v12 = vpop.f32.mrf.mxu3 }
 0x3a3   : > { %v1150_v17 = vadd.f32 %v1149_v12, %v1113_v4  ;;  %v1249_v54 = vpop.f32.mrf.mxu2 }
 0x3a5   : > { %v1179_v18 = vadd.f32 %v1178_v57, %v1150_v17 }
 0x3a7   : > { %v1220_v19 = vadd.f32 %v1219_v16, %v1179_v18 }
 0x3a9   : > { %v1250_v15 = vadd.f32 %v1249_v54, %v1220_v19 }
 0x3aa   : > { %v1276_v24 = vpop.f32.mrf.mxu3 }
 0x3ab   : > { %v1277_v27 = vadd.f32 %v1276_v24, %v1250_v15 }
 0x3ad   : > { %v1310_v20 = vadd.f32 %v1309_v25, %v1277_v27 }
 0x3af   : > { %v1335_v10 = vadd.f32 %v1334_v31, %v1310_v20 }
 0x3b1   : > { %v1337_v60 = vadd.f32 %v1335_v10, %v1886_v37  ;;  %v1408_v37 = vand.u32 4294901760, %v2306_v47 }
 0x3b3   : > { %v1338_v3 = vmax.f32 %v1337_v60, 0.0  ;;  %v1409_v28 = vsub.f32 %v2306_v47, %v1408_v37  ;;  %1499 = vmatpush.msrb.mxu2 %v1408_v37 }
 0x3b5   : > { %1348 = vrot.lane.b32.xlu0 %v1338_v3, %s1752_s9  ;;  %1343 = vrot.lane.b32.xlu2 %v1338_v3, %s1750_s29  ;;  %v1410_v39 = vand.u32 4294901760, %v1409_v28 }
 0x3b6   : > { %1340 = vrot.lane.b32.xlu1 %v1338_v3, %s1748_s22  ;;  %1503 = vmatpush.msrb.mxu2 %v1414_v1  ;;  %s267_s22 = sand.u32 1, %s1733_s25  }
 0x3b7   : > { %1411 = vmatpush.msra.mxu3 %v1410_v39  ;;  %s1618_s29 = sshll.u32 %s267_s22, 2 }
 0x3b8   : > { %1507 = vmatpush.msrb.mxu2 %v1420_v22  ;;  %s269_s14 = scalar_lea.vmem [#allocation3], %s1618_s29 }
 0x3b9   : > { %1417 = vmatpush.msra.mxu3 %v1416_v43  ;;  %s1552_s19 = sshll.u32 %s269_s14, 4  ;;  %s1553_s19 = int_to_ptr.vmem [resolvable:$true] %s1552_s19 }
 0x3bb   : > { %1423 = vmatpush.msra.mxu3 %v1422_v2 }
 0x3bd   : > { %1527 = vmatpush.msrb.mxu3 %v2296_v14 }
 0x3be   : > { %1351 = vrot.lane.b32.xlu1 %v1338_v3, %s1751_s8  ;;  %s1621_s8 = sshll.u32 %s1816_s28, 2  ;;  %s1540_s28 = scalar_lea.sflag [#allocation4], %s267_s22 }
 0x3bf   : > { %1529 = vmatpush.msrb.mxu3 %v1380_v11  ;;  %s1550_s21 = scalar_lea.hbm %s2403_s7, %s1621_s8 }
 0x3c0   : > { %s1554_s23 = sshll.u32 %s1550_s21, 4  ;;  %s1555_s23 = int_to_ptr.hbm [resolvable:$true] %s1554_s23 }
 0x3c1   : > { %1531 = vmatpush.msrb.mxu3 %v1382_v52  ;;  %s1693_s15 = sshra.s32 %s1555_s23, 4  ;;  %s1694_s15 = int_to_ptr.hbm [resolvable:$true] %s1693_s15 }
 0x3c2   : > { %s1695_s16 = scalar_lea.hbm %s1694_s15, 4  ;;  %p1700_p0 = scmp.lt.s32.totalorder %s1694_s15, %s2403_s7 }
 0x3c3   : > { %p1696_p11 = scmp.ne.s32.totalorder %s1694_s15, %s1695_s16  ;;  %p1701_p1 = scmp.lt.s32.totalorder %s1699_s18, %s1695_s16 }
 0x3c5   : > { %p1697_p12 = pnand %p1696_p11, %p1833_p5  ;;  %p1702_p2 = por %p1701_p1, %p1700_p0 }
 0x3c7   : > { %p1698_p13 = pneg %p1697_p12 }
 0x3c9   : > { %p1703_p3 = pnand %p1702_p2, %p1698_p13 }
 0x40f   : > { %v1344_v55 = vpop.permute.xlu2 %1343 }
 0x427   : > { %v1349_v32 = vpop.permute.xlu0 %1348 }
 0x428   : > { %v1341_v45 = vpop.permute.xlu1 %1340 }
 0x429   : > { %v1346_v61 = vsel %vm291_vm5, %v1341_v45, %v1344_v55 }
 0x42a   : > { %v1347_v6 = vmax.f32 %v1338_v3, %v1346_v61 }
 0x430   : > { %v1352_v44 = vpop.permute.xlu1 %1351 }
 0x431   : > { %v1354_v7 = vsel %vm299_vm7, %v1349_v32, %v1352_v44 }
 0x432   : > { %v1355_v13 = vmax.f32 %v1347_v6, %v1354_v7 }
 0x434   : > { %v1360_v46 = vsel %vm354_vm2, %v1355_v13, 0 }
 0x435   : > { %v1384_v33 = vand.u32 4294901760, %v1360_v46 }
 0x437   : > { %v1385_v58 = vsub.f32 %v1360_v46, %v1384_v33  ;;  %1425 = vmatmul.f32.vlgmr.msra.gmra.mxu3 %v1384_v33 }
 0x439   : > { %1453 = vmatmul.f32.vlgmr.msrb.gmra.mxu0 %v1385_v58  ;;  %v1386_v9 = vand.u32 4294901760, %v1385_v58 }
 0x43b   : > { %1479 = vmatmul.f32.vlgmr.msrb.gmra.mxu1 %v1386_v9  ;;  %v1387_v34 = vsub.f32 %v1385_v58, %v1386_v9 }
 0x43d   : > { %v1388_v59 = vand.u32 4294901760, %v1387_v34 }
 0x43f   : > { %1389 = vmatmul.f32.vlgmr.msra.gmra.mxu2 %v1388_v59  ;;  %1533 = vmatmul.f32.vlgmr.msrb.gmra.mxu3 %v1384_v33 }
 0x447   : > { %1509 = vmatmul.f32.vlgmr.msrb.gmra.mxu2 %v1384_v33 }
 0x4b6   : > { %v1454_v14 = vpop.f32.mrf.mxu0 }
 0x4b8   : > { %v1480_v51 = vpop.f32.mrf.mxu1 }
 0x4ba   : > { %v1426_v62 = vpop.f32.mrf.mxu3 }
 0x4c2   : > { %v1390_v63 = vpop.f32.mrf.mxu2  ;;  %v1534_v21 = vpop.f32.mrf.mxu3 }
 0x4c3   : > { %v1427_v36 = vadd.f32 %v1426_v62, %v1390_v63 }
 0x4c5   : > { %v1455_v47 = vadd.f32 %v1454_v14, %v1427_v36 }
 0x4c7   : > { %v1481_v56 = vadd.f32 %v1480_v51, %v1455_v47 }
 0x4ca   : > { %v1510_v0 = vpop.f32.mrf.mxu2 }
 0x4cb   : > { %v1511_v5 = vadd.f32 %v1510_v0, %v1481_v56 }
 0x4cd   : > { %v1535_v23 = vadd.f32 %v1534_v21, %v1511_v5 }
 0x4cf   : > { %1538 = vst.msk [vmem:[%s269_s14] sm:$0xf] %vm1537_vm10, %v1535_v23 }
 0x4d0   : > { %1706 = shalt.err (!%p1703_p3)
}
 0x4d1   : > { %1624 = dma.vmem_to_hbm [thread:$0]  (%p1833_p5), %s1553_s19, 64, %s1555_s23, %s1540_s28  }
 0x4d2 PF: > { %p1630_p4 = scmp.ge.s32.totalorder %s1741_s27, 2  ;;  %s1566_s22 = sand.u32 1, %s1729_s24  }
 0x4d3   : > { %s1567_s9 = scalar_lea.sflag [#allocation4], %s1566_s22 }
 0x4d4   : > { %p1627_p7 = pnand %p1630_p4, %p1837_p6 }
 0x4d6   : > { %p1628_p8 = pneg %p1627_p7 }
 0x4d8   : > { %1724 = dma.done.wait (%p1628_p8), %s1567_s9, 64  }
 0x4d9   : > { %1726 = vsyncadd (%p1628_p8), %s1567_s9, 4294967232  ;;  %p17_p9 = scmp.ge.s32.totalorder %s1820_s30, 4   ;;  %s2415_s24 = smov %s1733_s25 }
 0x4da   : > { %s2416_s25 = smov %s1737_s26  ;;  %s2417_s26 = smov %s1831_s10 }
 0x4db   : > { %s2418_s27 = smov %s1820_s30  ;;  %19 = sbr.rel (!%p17_p9) target bundleno = 3 (0x3), region = 83 }
 0x4e0   :  { %1573 = vsyncpa [#allocation4], 1 }
 0x4e1   :  { %1575 = vsyncpa [#allocation4 + $0x1], 1 }

</bundles_post_ra>
